<compile_context>
chip_gen: v7x
topology: tpu7x:2x2x1
jax: 0.10.0
libtpu: 0.0.40
codegen_flags: <defaults>
</compile_context>

<pallas_src>
import functools

import jax
import jax.numpy as jnp
from jax.experimental import pallas as pl
from jax.experimental.pallas import tpu as pltpu

NEG_INF = -1e30


def _fused_dual_gat_kernel(x1_ref, x2_ref, adj1_ref, adj2_ref, g_ref,
                           w_ref, att_ref, bias_ref, out1_ref, out2_ref):
    """Whole DualGATNet forward (all layers, both graphs) in one kernel.

    w_ref    : (2*L, F, F)   stacked [l0.gat1, l0.gat2, l1.gat1, l1.gat2, ...]
    att_ref  : (2*L, F, 2)   column 0 = att_dst, column 1 = att_src
    bias_ref : (2*L, 1, F)
    adjX_ref : dense mask, adj[i, j] = 1 iff edge j -> i (self-loops included)
    g_ref    : (N1, N2) one-hot of group_assignment (gather as matmul)
    """
    mask1 = adj1_ref[...] > 0.0
    mask2 = adj2_ref[...] > 0.0
    g = g_ref[...]

    def gat(x, mask, idx):
        # Linear transform (MXU).
        h = jnp.dot(x, w_ref[idx], preferred_element_type=jnp.float32)      # (N, F_out)
        # Packed attention logits: col 0 = att_dst . h_i, col 1 = att_src . h_j (MXU).
        s = jnp.dot(h, att_ref[idx], preferred_element_type=jnp.float32)    # (N, 2)
        a_dst = s[:, 0:1]                            # (N, 1): target-node term
        a_src = jnp.transpose(s[:, 1:2])             # (1, N): source-node term (XLU transpose)
        e = a_dst + a_src                            # e[i, j] = dst_i + src_j
        e = jnp.maximum(e, 0.2 * e)                  # LeakyReLU(negative_slope=0.2)
        e = jnp.where(mask, e, NEG_INF)              # mask non-edges
        m = jnp.max(e, axis=-1, keepdims=True)       # every row has >=1 real entry (self-loop)
        p = jnp.exp(e - m)                           # masked entries underflow to exactly 0
        denom = jnp.sum(p, axis=-1, keepdims=True)
        alpha = p * pl.reciprocal(denom, approx=True)
        # Weighted aggregation of neighbours (MXU) + bias.
        return jnp.dot(alpha, h, preferred_element_type=jnp.float32) + bias_ref[idx]

    x1 = x1_ref[...]
    x2 = x2_ref[...]
    num_layers = w_ref.shape[0] // 2
    for layer in range(num_layers):                  # unrolled at trace time (tiny tensors)
        x1_out = gat(x1, mask1, 2 * layer)
        x2_out = gat(x2, mask2, 2 * layer + 1)
        # x1 <- x1_out + x2_out[group_assignment]  (gather expressed as one-hot matmul)
        x1 = x1_out + jnp.dot(g, x2_out, preferred_element_type=jnp.float32)
        x2 = x2_out

    out1_ref[...] = x1
    out2_ref[...] = x2


def _vmem_spec():
    return pl.BlockSpec(memory_space=pltpu.MemorySpace.VMEM)


def dual_gat_net(w_all, att_all, bias_all, x1, adj1, x2, adj2, gather_mat):
    n1 = x1.shape[0]
    n2 = x2.shape[0]
    f_out = w_all.shape[-1]
    return pl.pallas_call(
        _fused_dual_gat_kernel,
        out_shape=(jax.ShapeDtypeStruct((n1, f_out), jnp.float32),
                   jax.ShapeDtypeStruct((n2, f_out), jnp.float32)),
        in_specs=[_vmem_spec()] * 8,
        out_specs=(_vmem_spec(), _vmem_spec()),
    )(x1, x2, adj1, adj2, gather_mat, w_all, att_all, bias_all)


def _reference(w_all, att_all, bias_all, x1, adj1, x2, adj2, gather_mat):
    """Pure-JAX reference of the same forward (PyG single-head GATConv semantics)."""
    def gat(x, adj, w, att, bias):
        h = x @ w
        s = h @ att
        e = s[:, 0:1] + s[:, 1:2].T
        e = jnp.where(e > 0, e, 0.2 * e)
        e = jnp.where(adj > 0, e, -jnp.inf)
        alpha = jax.nn.softmax(e, axis=-1)
        return alpha @ h + bias
    num_layers = w_all.shape[0] // 2
    for layer in range(num_layers):
        i1, i2 = 2 * layer, 2 * layer + 1
        y1 = gat(x1, adj1, w_all[i1], att_all[i1], bias_all[i1])
        y2 = gat(x2, adj2, w_all[i2], att_all[i2], bias_all[i2])
        x1 = y1 + gather_mat @ y2
        x2 = y2
    return x1, x2


def init_gat_params(key, f_in, f_out):
    k_w, k_s, k_d, k_b = jax.random.split(key, 4)
    scale = 1.0 / jnp.sqrt(jnp.float32(f_in))
    w = jax.random.normal(k_w, (f_in, f_out), jnp.float32) * scale
    att_src = jax.random.normal(k_s, (f_out,), jnp.float32) * 0.1
    att_dst = jax.random.normal(k_d, (f_out,), jnp.float32) * 0.1
    att = jnp.stack([att_dst, att_src], axis=-1)          # (F_out, 2): [dst | src]
    bias = jax.random.normal(k_b, (1, f_out), jnp.float32) * 0.01
    return w, att, bias


def dense_adj(edge_index, n):
    """Dense mask adj[i, j] = 1 iff edge j -> i, plus self-loops (PyG add_self_loops=True)."""
    src, dst = edge_index
    adj = jnp.zeros((n, n), jnp.float32)
    adj = adj.at[dst, src].set(1.0)
    diag = jnp.arange(n)
    adj = adj.at[diag, diag].set(1.0)
    return adj


def ring_edges(n):
    """Bidirectional ring graph edge_index of shape (2, 2*n)."""
    i = jnp.arange(n)
    src = jnp.concatenate([i, (i + 1) % n])
    dst = jnp.concatenate([(i + 1) % n, i])
    return jnp.stack([src, dst]).astype(jnp.int32)


if __name__ == "__main__":
    key = jax.random.PRNGKey(0)

    # Small shapes consistent with the module: stacking DualGATConv(in_channels, out_channels)
    # twice requires in_channels == out_channels; the original script uses out_channels=16.
    N1, N2 = 16, 8
    in_channels = 16
    out_channels = 16
    num_layers = 2

    k_x1, k_x2, k_params = jax.random.split(key, 3)
    x1 = jax.random.normal(k_x1, (N1, in_channels), jnp.float32)
    x2 = jax.random.normal(k_x2, (N2, in_channels), jnp.float32)

    edge_index1 = ring_edges(N1)                                          # (2, 32)
    edge_index2 = ring_edges(N2)                                          # (2, 16)
    group_assignment = (jnp.arange(N1) % N2).astype(jnp.int32)            # (16,)

    adj1 = dense_adj(edge_index1, N1)                                     # (16, 16)
    adj2 = dense_adj(edge_index2, N2)                                     # (8, 8)
    gather_mat = jax.nn.one_hot(group_assignment, N2, dtype=jnp.float32)  # (16, 8)

    # Deterministic params for num_layers DualGATConv layers, stacked as
    # [l0.gat1, l0.gat2, l1.gat1, l1.gat2, ...] so the fused kernel indexes them statically.
    layer_keys = jax.random.split(k_params, num_layers)
    ws, atts, bs = [], [], []
    f_in = in_channels
    for lk in layer_keys:
        k1, k2 = jax.random.split(lk)
        for kk in (k1, k2):
            w, att, b = init_gat_params(kk, f_in, out_channels)
            ws.append(w)
            atts.append(att)
            bs.append(b)
        f_in = out_channels
    w_all = jnp.stack(ws)       # (2*L, F_in, F_out)
    att_all = jnp.stack(atts)   # (2*L, F_out, 2)
    bias_all = jnp.stack(bs)    # (2*L, 1, F_out)

    run = jax.jit(functools.partial(dual_gat_net, w_all, att_all, bias_all))
    x1_out, x2_out = run(x1, adj1, x2, adj2, gather_mat)
    jax.block_until_ready((x1_out, x2_out))

    # Correctness vs pure-JAX reference (loose tol: approx reciprocal on the EUP path).
    r1, r2 = _reference(w_all, att_all, bias_all, x1, adj1, x2, adj2, gather_mat)

    assert x1_out.shape == (N1, out_channels)
    assert x2_out.shape == (N2, out_channels)
    assert bool(jnp.all(jnp.isfinite(x1_out))) and bool(jnp.all(jnp.isfinite(x2_out)))
    assert bool(jnp.allclose(x1_out, r1, rtol=5e-2, atol=5e-2))
    assert bool(jnp.allclose(x2_out, r2, rtol=5e-2, atol=5e-2))
    print("KERNEL_OK")
</pallas_src>

<mosaic_0001>
module attributes {stable_mosaic.version = 11 : i64} {
  func.func @_fused_dual_gat_kernel(%arg0: memref<16x16xf32, #tpu.memory_space<vmem>>, %arg1: memref<8x16xf32, #tpu.memory_space<vmem>>, %arg2: memref<16x16xf32, #tpu.memory_space<vmem>>, %arg3: memref<8x8xf32, #tpu.memory_space<vmem>>, %arg4: memref<16x8xf32, #tpu.memory_space<vmem>>, %arg5: memref<4x16x16xf32, #tpu.memory_space<vmem>>, %arg6: memref<4x16x2xf32, #tpu.memory_space<vmem>>, %arg7: memref<4x1x16xf32, #tpu.memory_space<vmem>>, %arg8: memref<16x16xf32, #tpu.memory_space<vmem>>, %arg9: memref<8x16xf32, #tpu.memory_space<vmem>>) attributes {dimension_semantics = [], scalar_prefetch = 0 : i64, scratch_operands = 0 : i64, tpu.core_type = #tpu.core_type<tc>} {
    %c0 = arith.constant 0 : index
    %c0_0 = arith.constant 0 : index
    %0 = vector.load %arg2[%c0, %c0_0] : memref<16x16xf32, #tpu.memory_space<vmem>>, vector<16x16xf32>
    %cst = arith.constant 0.000000e+00 : f32
    %1 = vector.broadcast %cst : f32 to vector<16x16xf32>
    %2 = arith.cmpf ogt, %0, %1 : vector<16x16xf32>
    %c0_1 = arith.constant 0 : index
    %c0_2 = arith.constant 0 : index
    %3 = vector.load %arg3[%c0_1, %c0_2] : memref<8x8xf32, #tpu.memory_space<vmem>>, vector<8x8xf32>
    %cst_3 = arith.constant 0.000000e+00 : f32
    %4 = vector.broadcast %cst_3 : f32 to vector<8x8xf32>
    %5 = arith.cmpf ogt, %3, %4 : vector<8x8xf32>
    %c0_4 = arith.constant 0 : index
    %c0_5 = arith.constant 0 : index
    %6 = vector.load %arg4[%c0_4, %c0_5] : memref<16x8xf32, #tpu.memory_space<vmem>>, vector<16x8xf32>
    %c0_6 = arith.constant 0 : index
    %c0_7 = arith.constant 0 : index
    %7 = vector.load %arg0[%c0_6, %c0_7] : memref<16x16xf32, #tpu.memory_space<vmem>>, vector<16x16xf32>
    %c0_8 = arith.constant 0 : index
    %c0_9 = arith.constant 0 : index
    %8 = vector.load %arg1[%c0_8, %c0_9] : memref<8x16xf32, #tpu.memory_space<vmem>>, vector<8x16xf32>
    %c0_10 = arith.constant 0 : index
    %c0_11 = arith.constant 0 : index
    %c0_12 = arith.constant 0 : index
    %9 = vector.load %arg5[%c0_10, %c0_11, %c0_12] : memref<4x16x16xf32, #tpu.memory_space<vmem>>, vector<1x16x16xf32>
    %10 = vector.shape_cast %9 : vector<1x16x16xf32> to vector<16x16xf32>
    %cst_13 = arith.constant dense<0.000000e+00> : vector<16x16xf32>
    %11 = tpu.matmul %7, %10, %cst_13 {dimension_numbers = #tpu.dot_dimension_numbers<[1], [0], [0], [1], [0, 0, 1, 1], [], []>} : vector<16x16xf32>, vector<16x16xf32>, vector<16x16xf32> -> vector<16x16xf32>
    %c0_14 = arith.constant 0 : index
    %c0_15 = arith.constant 0 : index
    %c0_16 = arith.constant 0 : index
    %12 = vector.load %arg6[%c0_14, %c0_15, %c0_16] : memref<4x16x2xf32, #tpu.memory_space<vmem>>, vector<1x16x2xf32>
    %13 = vector.shape_cast %12 : vector<1x16x2xf32> to vector<16x2xf32>
    %cst_17 = arith.constant dense<0.000000e+00> : vector<16x2xf32>
    %14 = tpu.matmul %11, %13, %cst_17 {dimension_numbers = #tpu.dot_dimension_numbers<[1], [0], [0], [1], [0, 0, 1, 1], [], []>} : vector<16x16xf32>, vector<16x2xf32>, vector<16x2xf32> -> vector<16x2xf32>
    %15 = vector.extract_strided_slice %14 {offsets = [0, 0], sizes = [16, 1], strides = [1, 1]} : vector<16x2xf32> to vector<16x1xf32>
    %16 = vector.extract_strided_slice %14 {offsets = [0, 1], sizes = [16, 1], strides = [1, 1]} : vector<16x2xf32> to vector<16x1xf32>
    %17 = tpu.transpose %16, [1, 0] : vector<16x1xf32> -> vector<1x16xf32>
    %18 = vector.broadcast %15 : vector<16x1xf32> to vector<16x16xf32>
    %19 = vector.broadcast %17 : vector<1x16xf32> to vector<16x16xf32>
    %20 = arith.addf %18, %19 : vector<16x16xf32>
    %cst_18 = arith.constant 2.000000e-01 : f32
    %21 = vector.broadcast %cst_18 : f32 to vector<16x16xf32>
    %22 = arith.mulf %21, %20 : vector<16x16xf32>
    %23 = arith.maximumf %20, %22 : vector<16x16xf32>
    %cst_19 = arith.constant -1.000000e+30 : f32
    %24 = vector.broadcast %cst_19 : f32 to vector<16x16xf32>
    %25 = arith.select %2, %23, %24 : vector<16x16xi1>, vector<16x16xf32>
    %cst_20 = arith.constant dense<0xFF800000> : vector<16xf32>
    %26 = vector.multi_reduction <maximumf>, %25, %cst_20 [1] : vector<16x16xf32> to vector<16xf32>
    %27 = vector.shape_cast %26 : vector<16xf32> to vector<16x1xf32>
    %28 = vector.broadcast %27 : vector<16x1xf32> to vector<16x16xf32>
    %29 = arith.subf %25, %28 : vector<16x16xf32>
    %30 = math.exp %29 : vector<16x16xf32>
    %cst_21 = arith.constant dense<0.000000e+00> : vector<16xf32>
    %31 = vector.multi_reduction <add>, %30, %cst_21 [1] : vector<16x16xf32> to vector<16xf32>
    %32 = vector.shape_cast %31 : vector<16xf32> to vector<16x1xf32>
    %33 = tpu.reciprocal %32 {approx = true} : vector<16x1xf32> -> vector<16x1xf32>
    %34 = vector.broadcast %33 : vector<16x1xf32> to vector<16x16xf32>
    %35 = arith.mulf %30, %34 : vector<16x16xf32>
    %cst_22 = arith.constant dense<0.000000e+00> : vector<16x16xf32>
    %36 = tpu.matmul %35, %11, %cst_22 {dimension_numbers = #tpu.dot_dimension_numbers<[1], [0], [0], [1], [0, 0, 1, 1], [], []>} : vector<16x16xf32>, vector<16x16xf32>, vector<16x16xf32> -> vector<16x16xf32>
    %c0_23 = arith.constant 0 : index
    %c0_24 = arith.constant 0 : index
    %c0_25 = arith.constant 0 : index
    %37 = vector.load %arg7[%c0_23, %c0_24, %c0_25] : memref<4x1x16xf32, #tpu.memory_space<vmem>>, vector<1x1x16xf32>
    %38 = vector.shape_cast %37 : vector<1x1x16xf32> to vector<1x16xf32>
    %39 = vector.broadcast %38 : vector<1x16xf32> to vector<16x16xf32>
    %40 = arith.addf %36, %39 : vector<16x16xf32>
    %c1 = arith.constant 1 : index
    %c0_26 = arith.constant 0 : index
    %c0_27 = arith.constant 0 : index
    %41 = vector.load %arg5[%c1, %c0_26, %c0_27] : memref<4x16x16xf32, #tpu.memory_space<vmem>>, vector<1x16x16xf32>
    %42 = vector.shape_cast %41 : vector<1x16x16xf32> to vector<16x16xf32>
    %cst_28 = arith.constant dense<0.000000e+00> : vector<8x16xf32>
    %43 = tpu.matmul %8, %42, %cst_28 {dimension_numbers = #tpu.dot_dimension_numbers<[1], [0], [0], [1], [0, 0, 1, 1], [], []>} : vector<8x16xf32>, vector<16x16xf32>, vector<8x16xf32> -> vector<8x16xf32>
    %c1_29 = arith.constant 1 : index
    %c0_30 = arith.constant 0 : index
    %c0_31 = arith.constant 0 : index
    %44 = vector.load %arg6[%c1_29, %c0_30, %c0_31] : memref<4x16x2xf32, #tpu.memory_space<vmem>>, vector<1x16x2xf32>
    %45 = vector.shape_cast %44 : vector<1x16x2xf32> to vector<16x2xf32>
    %cst_32 = arith.constant dense<0.000000e+00> : vector<8x2xf32>
    %46 = tpu.matmul %43, %45, %cst_32 {dimension_numbers = #tpu.dot_dimension_numbers<[1], [0], [0], [1], [0, 0, 1, 1], [], []>} : vector<8x16xf32>, vector<16x2xf32>, vector<8x2xf32> -> vector<8x2xf32>
    %47 = vector.extract_strided_slice %46 {offsets = [0, 0], sizes = [8, 1], strides = [1, 1]} : vector<8x2xf32> to vector<8x1xf32>
    %48 = vector.extract_strided_slice %46 {offsets = [0, 1], sizes = [8, 1], strides = [1, 1]} : vector<8x2xf32> to vector<8x1xf32>
    %49 = tpu.transpose %48, [1, 0] : vector<8x1xf32> -> vector<1x8xf32>
    %50 = vector.broadcast %47 : vector<8x1xf32> to vector<8x8xf32>
    %51 = vector.broadcast %49 : vector<1x8xf32> to vector<8x8xf32>
    %52 = arith.addf %50, %51 : vector<8x8xf32>
    %cst_33 = arith.constant 2.000000e-01 : f32
    %53 = vector.broadcast %cst_33 : f32 to vector<8x8xf32>
    %54 = arith.mulf %53, %52 : vector<8x8xf32>
    %55 = arith.maximumf %52, %54 : vector<8x8xf32>
    %cst_34 = arith.constant -1.000000e+30 : f32
    %56 = vector.broadcast %cst_34 : f32 to vector<8x8xf32>
    %57 = arith.select %5, %55, %56 : vector<8x8xi1>, vector<8x8xf32>
    %cst_35 = arith.constant dense<0xFF800000> : vector<8xf32>
    %58 = vector.multi_reduction <maximumf>, %57, %cst_35 [1] : vector<8x8xf32> to vector<8xf32>
    %59 = vector.shape_cast %58 : vector<8xf32> to vector<8x1xf32>
    %60 = vector.broadcast %59 : vector<8x1xf32> to vector<8x8xf32>
    %61 = arith.subf %57, %60 : vector<8x8xf32>
    %62 = math.exp %61 : vector<8x8xf32>
    %cst_36 = arith.constant dense<0.000000e+00> : vector<8xf32>
    %63 = vector.multi_reduction <add>, %62, %cst_36 [1] : vector<8x8xf32> to vector<8xf32>
    %64 = vector.shape_cast %63 : vector<8xf32> to vector<8x1xf32>
    %65 = tpu.reciprocal %64 {approx = true} : vector<8x1xf32> -> vector<8x1xf32>
    %66 = vector.broadcast %65 : vector<8x1xf32> to vector<8x8xf32>
    %67 = arith.mulf %62, %66 : vector<8x8xf32>
    %cst_37 = arith.constant dense<0.000000e+00> : vector<8x16xf32>
    %68 = tpu.matmul %67, %43, %cst_37 {dimension_numbers = #tpu.dot_dimension_numbers<[1], [0], [0], [1], [0, 0, 1, 1], [], []>} : vector<8x8xf32>, vector<8x16xf32>, vector<8x16xf32> -> vector<8x16xf32>
    %c1_38 = arith.constant 1 : index
    %c0_39 = arith.constant 0 : index
    %c0_40 = arith.constant 0 : index
    %69 = vector.load %arg7[%c1_38, %c0_39, %c0_40] : memref<4x1x16xf32, #tpu.memory_space<vmem>>, vector<1x1x16xf32>
    %70 = vector.shape_cast %69 : vector<1x1x16xf32> to vector<1x16xf32>
    %71 = vector.broadcast %70 : vector<1x16xf32> to vector<8x16xf32>
    %72 = arith.addf %68, %71 : vector<8x16xf32>
    %cst_41 = arith.constant dense<0.000000e+00> : vector<16x16xf32>
    %73 = tpu.matmul %6, %72, %cst_41 {dimension_numbers = #tpu.dot_dimension_numbers<[1], [0], [0], [1], [0, 0, 1, 1], [], []>} : vector<16x8xf32>, vector<8x16xf32>, vector<16x16xf32> -> vector<16x16xf32>
    %74 = arith.addf %40, %73 : vector<16x16xf32>
    %c2 = arith.constant 2 : index
    %c0_42 = arith.constant 0 : index
    %c0_43 = arith.constant 0 : index
    %75 = vector.load %arg5[%c2, %c0_42, %c0_43] : memref<4x16x16xf32, #tpu.memory_space<vmem>>, vector<1x16x16xf32>
    %76 = vector.shape_cast %75 : vector<1x16x16xf32> to vector<16x16xf32>
    %cst_44 = arith.constant dense<0.000000e+00> : vector<16x16xf32>
    %77 = tpu.matmul %74, %76, %cst_44 {dimension_numbers = #tpu.dot_dimension_numbers<[1], [0], [0], [1], [0, 0, 1, 1], [], []>} : vector<16x16xf32>, vector<16x16xf32>, vector<16x16xf32> -> vector<16x16xf32>
    %c2_45 = arith.constant 2 : index
    %c0_46 = arith.constant 0 : index
    %c0_47 = arith.constant 0 : index
    %78 = vector.load %arg6[%c2_45, %c0_46, %c0_47] : memref<4x16x2xf32, #tpu.memory_space<vmem>>, vector<1x16x2xf32>
    %79 = vector.shape_cast %78 : vector<1x16x2xf32> to vector<16x2xf32>
    %cst_48 = arith.constant dense<0.000000e+00> : vector<16x2xf32>
    %80 = tpu.matmul %77, %79, %cst_48 {dimension_numbers = #tpu.dot_dimension_numbers<[1], [0], [0], [1], [0, 0, 1, 1], [], []>} : vector<16x16xf32>, vector<16x2xf32>, vector<16x2xf32> -> vector<16x2xf32>
    %81 = vector.extract_strided_slice %80 {offsets = [0, 0], sizes = [16, 1], strides = [1, 1]} : vector<16x2xf32> to vector<16x1xf32>
    %82 = vector.extract_strided_slice %80 {offsets = [0, 1], sizes = [16, 1], strides = [1, 1]} : vector<16x2xf32> to vector<16x1xf32>
    %83 = tpu.transpose %82, [1, 0] : vector<16x1xf32> -> vector<1x16xf32>
    %84 = vector.broadcast %81 : vector<16x1xf32> to vector<16x16xf32>
    %85 = vector.broadcast %83 : vector<1x16xf32> to vector<16x16xf32>
    %86 = arith.addf %84, %85 : vector<16x16xf32>
    %cst_49 = arith.constant 2.000000e-01 : f32
    %87 = vector.broadcast %cst_49 : f32 to vector<16x16xf32>
    %88 = arith.mulf %87, %86 : vector<16x16xf32>
    %89 = arith.maximumf %86, %88 : vector<16x16xf32>
    %cst_50 = arith.constant -1.000000e+30 : f32
    %90 = vector.broadcast %cst_50 : f32 to vector<16x16xf32>
    %91 = arith.select %2, %89, %90 : vector<16x16xi1>, vector<16x16xf32>
    %cst_51 = arith.constant dense<0xFF800000> : vector<16xf32>
    %92 = vector.multi_reduction <maximumf>, %91, %cst_51 [1] : vector<16x16xf32> to vector<16xf32>
    %93 = vector.shape_cast %92 : vector<16xf32> to vector<16x1xf32>
    %94 = vector.broadcast %93 : vector<16x1xf32> to vector<16x16xf32>
    %95 = arith.subf %91, %94 : vector<16x16xf32>
    %96 = math.exp %95 : vector<16x16xf32>
    %cst_52 = arith.constant dense<0.000000e+00> : vector<16xf32>
    %97 = vector.multi_reduction <add>, %96, %cst_52 [1] : vector<16x16xf32> to vector<16xf32>
    %98 = vector.shape_cast %97 : vector<16xf32> to vector<16x1xf32>
    %99 = tpu.reciprocal %98 {approx = true} : vector<16x1xf32> -> vector<16x1xf32>
    %100 = vector.broadcast %99 : vector<16x1xf32> to vector<16x16xf32>
    %101 = arith.mulf %96, %100 : vector<16x16xf32>
    %cst_53 = arith.constant dense<0.000000e+00> : vector<16x16xf32>
    %102 = tpu.matmul %101, %77, %cst_53 {dimension_numbers = #tpu.dot_dimension_numbers<[1], [0], [0], [1], [0, 0, 1, 1], [], []>} : vector<16x16xf32>, vector<16x16xf32>, vector<16x16xf32> -> vector<16x16xf32>
    %c2_54 = arith.constant 2 : index
    %c0_55 = arith.constant 0 : index
    %c0_56 = arith.constant 0 : index
    %103 = vector.load %arg7[%c2_54, %c0_55, %c0_56] : memref<4x1x16xf32, #tpu.memory_space<vmem>>, vector<1x1x16xf32>
    %104 = vector.shape_cast %103 : vector<1x1x16xf32> to vector<1x16xf32>
    %105 = vector.broadcast %104 : vector<1x16xf32> to vector<16x16xf32>
    %106 = arith.addf %102, %105 : vector<16x16xf32>
    %c3 = arith.constant 3 : index
    %c0_57 = arith.constant 0 : index
    %c0_58 = arith.constant 0 : index
    %107 = vector.load %arg5[%c3, %c0_57, %c0_58] : memref<4x16x16xf32, #tpu.memory_space<vmem>>, vector<1x16x16xf32>
    %108 = vector.shape_cast %107 : vector<1x16x16xf32> to vector<16x16xf32>
    %cst_59 = arith.constant dense<0.000000e+00> : vector<8x16xf32>
    %109 = tpu.matmul %72, %108, %cst_59 {dimension_numbers = #tpu.dot_dimension_numbers<[1], [0], [0], [1], [0, 0, 1, 1], [], []>} : vector<8x16xf32>, vector<16x16xf32>, vector<8x16xf32> -> vector<8x16xf32>
    %c3_60 = arith.constant 3 : index
    %c0_61 = arith.constant 0 : index
    %c0_62 = arith.constant 0 : index
    %110 = vector.load %arg6[%c3_60, %c0_61, %c0_62] : memref<4x16x2xf32, #tpu.memory_space<vmem>>, vector<1x16x2xf32>
    %111 = vector.shape_cast %110 : vector<1x16x2xf32> to vector<16x2xf32>
    %cst_63 = arith.constant dense<0.000000e+00> : vector<8x2xf32>
    %112 = tpu.matmul %109, %111, %cst_63 {dimension_numbers = #tpu.dot_dimension_numbers<[1], [0], [0], [1], [0, 0, 1, 1], [], []>} : vector<8x16xf32>, vector<16x2xf32>, vector<8x2xf32> -> vector<8x2xf32>
    %113 = vector.extract_strided_slice %112 {offsets = [0, 0], sizes = [8, 1], strides = [1, 1]} : vector<8x2xf32> to vector<8x1xf32>
    %114 = vector.extract_strided_slice %112 {offsets = [0, 1], sizes = [8, 1], strides = [1, 1]} : vector<8x2xf32> to vector<8x1xf32>
    %115 = tpu.transpose %114, [1, 0] : vector<8x1xf32> -> vector<1x8xf32>
    %116 = vector.broadcast %113 : vector<8x1xf32> to vector<8x8xf32>
    %117 = vector.broadcast %115 : vector<1x8xf32> to vector<8x8xf32>
    %118 = arith.addf %116, %117 : vector<8x8xf32>
    %cst_64 = arith.constant 2.000000e-01 : f32
    %119 = vector.broadcast %cst_64 : f32 to vector<8x8xf32>
    %120 = arith.mulf %119, %118 : vector<8x8xf32>
    %121 = arith.maximumf %118, %120 : vector<8x8xf32>
    %cst_65 = arith.constant -1.000000e+30 : f32
    %122 = vector.broadcast %cst_65 : f32 to vector<8x8xf32>
    %123 = arith.select %5, %121, %122 : vector<8x8xi1>, vector<8x8xf32>
    %cst_66 = arith.constant dense<0xFF800000> : vector<8xf32>
    %124 = vector.multi_reduction <maximumf>, %123, %cst_66 [1] : vector<8x8xf32> to vector<8xf32>
    %125 = vector.shape_cast %124 : vector<8xf32> to vector<8x1xf32>
    %126 = vector.broadcast %125 : vector<8x1xf32> to vector<8x8xf32>
    %127 = arith.subf %123, %126 : vector<8x8xf32>
    %128 = math.exp %127 : vector<8x8xf32>
    %cst_67 = arith.constant dense<0.000000e+00> : vector<8xf32>
    %129 = vector.multi_reduction <add>, %128, %cst_67 [1] : vector<8x8xf32> to vector<8xf32>
    %130 = vector.shape_cast %129 : vector<8xf32> to vector<8x1xf32>
    %131 = tpu.reciprocal %130 {approx = true} : vector<8x1xf32> -> vector<8x1xf32>
    %132 = vector.broadcast %131 : vector<8x1xf32> to vector<8x8xf32>
    %133 = arith.mulf %128, %132 : vector<8x8xf32>
    %cst_68 = arith.constant dense<0.000000e+00> : vector<8x16xf32>
    %134 = tpu.matmul %133, %109, %cst_68 {dimension_numbers = #tpu.dot_dimension_numbers<[1], [0], [0], [1], [0, 0, 1, 1], [], []>} : vector<8x8xf32>, vector<8x16xf32>, vector<8x16xf32> -> vector<8x16xf32>
    %c3_69 = arith.constant 3 : index
    %c0_70 = arith.constant 0 : index
    %c0_71 = arith.constant 0 : index
    %135 = vector.load %arg7[%c3_69, %c0_70, %c0_71] : memref<4x1x16xf32, #tpu.memory_space<vmem>>, vector<1x1x16xf32>
    %136 = vector.shape_cast %135 : vector<1x1x16xf32> to vector<1x16xf32>
    %137 = vector.broadcast %136 : vector<1x16xf32> to vector<8x16xf32>
    %138 = arith.addf %134, %137 : vector<8x16xf32>
    %cst_72 = arith.constant dense<0.000000e+00> : vector<16x16xf32>
    %139 = tpu.matmul %6, %138, %cst_72 {dimension_numbers = #tpu.dot_dimension_numbers<[1], [0], [0], [1], [0, 0, 1, 1], [], []>} : vector<16x8xf32>, vector<8x16xf32>, vector<16x16xf32> -> vector<16x16xf32>
    %140 = arith.addf %106, %139 : vector<16x16xf32>
    %c0_73 = arith.constant 0 : index
    %c0_74 = arith.constant 0 : index
    %141 = vector.load %arg8[%c0_73, %c0_74] : memref<16x16xf32, #tpu.memory_space<vmem>>, vector<16x16xf32>
    tpu.vector_store %arg8[%c0_73, %c0_74], %140 {strides = array<i32>} : memref<16x16xf32, #tpu.memory_space<vmem>>, vector<16x16xf32>,
    %c0_75 = arith.constant 0 : index
    %c0_76 = arith.constant 0 : index
    %142 = vector.load %arg9[%c0_75, %c0_76] : memref<8x16xf32, #tpu.memory_space<vmem>>, vector<8x16xf32>
    tpu.vector_store %arg9[%c0_75, %c0_76], %138 {strides = array<i32>} : memref<8x16xf32, #tpu.memory_space<vmem>>, vector<8x16xf32>,
    return
  }
}

</mosaic_0001>

<bundles_post_ra>
// kernel: dual_gat_net.1
= control target key start
LH: loop header
LB: loop body
LE: loop exit
PB: predicated region body
PF: predicated region fallthrough
CT: control target
= control target key end

     0   :  { %15 = vsyncpa [#allocation3], 0  ;;  %s2228_s0 = inlined_call_operand.vmem [shape: f32[16,16], index: 0, kind: input, shape index: {}]   ;;  %s2229_s1 = inlined_call_operand.vmem [shape: f32[8,16], index: 1, kind: input, shape index: {}]   ;;  %s2230_s2 = inlined_call_operand.hbm [shape: f32[16,16], index: 2, kind: input, shape index: {}]   ;;  %s2231_s3 = inlined_call_operand.hbm [shape: f32[8,8], index: 3, kind: input, shape index: {}]   ;;  %s2232_s4 = inlined_call_operand.vmem [shape: f32[16,8], index: 4, kind: input, shape index: {}]   ;;  %s2233_s5 = inlined_call_operand.hbm [shape: f32[4,16,16], index: 5, kind: input, shape index: {}]   ;;  %s2234_s6 = inlined_call_operand.hbm [shape: f32[4,16,2], index: 6, kind: input, shape index: {}]   ;;  %s2235_s7 = inlined_call_operand.vmem [shape: f32[4,1,16], index: 7, kind: input, shape index: {}]   ;;  %s2236_s8 = inlined_call_operand.hbm [shape: f32[16,16], index: 8, kind: output, shape index: {0}]   ;;  %s2237_s9 = inlined_call_operand.hbm [shape: f32[8,16], index: 9, kind: output, shape index: {1}]  }
   0x1   :  { %16 = vsyncpa [#allocation6], 0 }
   0x2   :  { %17 = vsyncpa [#allocation9], 0 }
   0x3   :  { %18 = vsyncpa [#allocation4], 0 }
   0x4   :  { %19 = vsyncpa [#allocation12], 0  ;;  %s1944_s30 = smov [#allocation5]   ;;  %s1945_s11 = smov [#allocation2]  }
   0x5   :  { %s42_s10 = sshll.u32 %s1944_s30, 4  ;;  %s29_s12 = sshll.u32 %s1945_s11, 4  ;;  %s43_s10 = int_to_ptr.vmem [resolvable:$true] %s42_s10  ;;  %s2007_s12 = int_to_ptr.vmem [resolvable:$true] %s29_s12 }
   0x6   :  { %s1802_s15 = scalar_lea.hbm %s2231_s3, 128 }
   0x7   :  { %p1803_p0 = scmp.ne.s32.totalorder %s2231_s3, %s1802_s15  ;;  %p1806_p1 = scmp.lt.u32.totalorder %s1802_s15, %s2231_s3 }
   0x9   :  { %p1808_p2 = pnand %p1806_p1, %p1803_p0 }
   0xb   :  { %1811 = shalt.err (!%p1808_p2)
}
   0xc   :  { %s1812_s20 = scalar_lea.vmem %s43_s10, 128  ;;  %p1817_p4 = scmp.lt.s32.totalorder %s43_s10, %s43_s10 }
   0xd   :  { %p1813_p3 = scmp.ne.s32.totalorder %s43_s10, %s1812_s20  ;;  %p1818_p5 = scmp.lt.s32.totalorder %s1812_s20, %s1812_s20 }
   0xf   :  { %p1819_p6 = por %p1818_p5, %p1817_p4 }
  0x11   :  { %p1820_p7 = pnand %p1819_p6, %p1813_p3 }
  0x13   :  { %1823 = shalt.err (!%p1820_p7)
}
  0x14   :  { %45 = dma.hbm_to_vmem [thread:$0]  %s2231_s3, 128, %s43_s10, [#allocation6]  }
  0x15   :  { %s1824_s25 = scalar_lea.hbm %s2230_s2, 256 }
  0x16   :  { %p1825_p8 = scmp.ne.s32.totalorder %s2230_s2, %s1824_s25  ;;  %p1828_p9 = scmp.lt.u32.totalorder %s1824_s25, %s2230_s2 }
  0x18   :  { %p1830_p10 = pnand %p1828_p9, %p1825_p8 }
  0x1a   :  { %1833 = shalt.err (!%p1830_p10)
}
  0x1b   :  { %s1834_s30 = scalar_lea.vmem %s2007_s12, 256  ;;  %p1839_p12 = scmp.lt.s32.totalorder %s2007_s12, %s2007_s12 }
  0x1c   :  { %p1835_p11 = scmp.ne.s32.totalorder %s2007_s12, %s1834_s30  ;;  %p1840_p13 = scmp.lt.s32.totalorder %s1834_s30, %s1834_s30 }
  0x1e   :  { %p1841_p0 = por %p1840_p13, %p1839_p12 }
  0x20   :  { %p1842_p1 = pnand %p1841_p0, %p1835_p11 }
  0x22   :  { %1845 = shalt.err (!%p1842_p1)
}
  0x23   :  { %s1946_s3 = smov 128   ;;  %s1947_s10 = smov 8  }
  0x24   :  { %35 = dma.hbm_to_vmem [thread:$0]  %s2230_s2, 256, %s2007_s12, [#allocation3], %s1946_s3, %s1946_s3, %s1947_s10  }
  0x25   :  { %s1948_s14 = smov [#allocation7]   ;;  %s1949_s16 = smov [#allocation8]  }
  0x26   :  { %s53_s15 = sshll.u32 %s1948_s14, 4  ;;  %s65_s17 = sshll.u32 %s1949_s16, 4  ;;  %s54_s15 = int_to_ptr.vmem [resolvable:$true] %s53_s15  ;;  %s2041_s17 = int_to_ptr.vmem [resolvable:$true] %s65_s17 }
  0x27   :  { %s1846_s20 = scalar_lea.hbm %s2233_s5, 1024 }
  0x28   :  { %p1847_p2 = scmp.ne.s32.totalorder %s2233_s5, %s1846_s20  ;;  %p1850_p3 = scmp.lt.u32.totalorder %s1846_s20, %s2233_s5 }
  0x2a   :  { %p1852_p4 = pnand %p1850_p3, %p1847_p2 }
  0x2c   :  { %1855 = shalt.err (!%p1852_p4)
}
  0x2d   :  { %s1856_s2 = scalar_lea.vmem %s54_s15, 1024  ;;  %p1861_p6 = scmp.lt.s32.totalorder %s54_s15, %s54_s15 }
  0x2e   :  { %p1857_p5 = scmp.ne.s32.totalorder %s54_s15, %s1856_s2  ;;  %p1862_p7 = scmp.lt.s32.totalorder %s1856_s2, %s1856_s2 }
  0x30   :  { %p1863_p8 = por %p1862_p7, %p1861_p6 }
  0x32   :  { %p1864_p9 = pnand %p1863_p8, %p1857_p5 }
  0x34   :  { %1867 = shalt.err (!%p1864_p9)
}
  0x35   :  { %59 = dma.hbm_to_vmem [thread:$0]  %s2233_s5, 1024, %s54_s15, [#allocation6], %s1946_s3, %s1946_s3, %s1947_s10  }
  0x36   :  { %s1868_s28 = scalar_lea.hbm %s2234_s6, 1024 }
  0x37   :  { %p1869_p10 = scmp.ne.s32.totalorder %s2234_s6, %s1868_s28  ;;  %p1872_p11 = scmp.lt.u32.totalorder %s1868_s28, %s2234_s6 }
  0x39   :  { %p1874_p12 = pnand %p1872_p11, %p1869_p10 }
  0x3b   :  { %1877 = shalt.err (!%p1874_p12)
}
  0x3c   :  { %s1878_s14 = scalar_lea.vmem %s2041_s17, 1024  ;;  %p1883_p0 = scmp.lt.s32.totalorder %s2041_s17, %s2041_s17 }
  0x3d   :  { %p1879_p13 = scmp.ne.s32.totalorder %s2041_s17, %s1878_s14  ;;  %p1884_p1 = scmp.lt.s32.totalorder %s1878_s14, %s1878_s14 }
  0x3f   :  { %p1885_p2 = por %p1884_p1, %p1883_p0 }
  0x41   :  { %p1886_p3 = pnand %p1885_p2, %p1879_p13 }
  0x43   :  { %1889 = shalt.err (!%p1886_p3)
}
  0x44   :  { %71 = dma.hbm_to_vmem [thread:$0]  %s2234_s6, 1024, %s2041_s17, [#allocation9], %s1946_s3, %s1946_s3, %s1947_s10  }
  0x45   :  { %1934 = dma.done.wait [#allocation3], 256  }
  0x46   :  { %1935 = vsyncadd [#allocation3], 4294967040 }
  0x47   :  { %1936 = dma.done.wait [#allocation6], 1152  }
  0x48   :  { %1937 = vsyncadd [#allocation6], 4294966144 }
  0x49   :  { %1938 = dma.done.wait [#allocation9], 1024  }
  0x4a   :  { %1939 = vsyncadd [#allocation9], 4294966272  ;;  %vm99_vm0 = vcmask 130048   ;;  %v97_v0 = vld [vmem:[#allocation7] sm:$0xff]  ;;  %v98_v1 = vld [vmem:[#allocation7 + $0x8] sm:$0xff]  ;;  %v1950_v11 = vmov 0   ;;  %v312_v22 = vlaneseq }
  0x4b   :  { %v94_v2 = vld [vmem:[%s2228_s0] sm:$0xff]  ;;  %v1719_v3 = vpack.c.bf16 %v98_v1, %v97_v0  ;;  %v181_v4 = vld [vmem:[#allocation8] sm:$0xff]  ;;  %v95_v7 = vld [vmem:[%s2228_s0 + $0x8] sm:$0xff]  ;;  %1776 = vset.pattern.permute.xlu1 %v1950_v11  ;;  %s1951_s19 = smov 127   ;;  %v1952_v18 = vmov 0.0|0.0   ;;  %vm1953_vm1 = vmmov 0  }
  0x4c   :  { %1633 = vmatprep.mubr.msk.f32.mxu0 %vm99_vm0, %v94_v2  ;;  %v182_v5 = vld [vmem:[#allocation8 + $0x8] sm:$0xff]  ;;  %v435_v16 = vld [vmem:[#allocation7 + $0x10] sm:$0xff]  ;;  %v436_v17 = vld [vmem:[#allocation7 + $0x18] sm:$0xff]  ;;  %v1954_v20 = vmov 0.0   ;;  %v313_v23 = vshrl.u32 %v312_v22, 7  ;;  %vm634_vm5 = vcmask 64512  }
  0x4d   :  { %v1723_v6 = vpack.c.bf16 %v182_v5, %v181_v4  ;;  %1720 = vmatprep.subr.bf16.mxu0 %v1719_v3  ;;  %v1732_v19 = vpack.c.bf16 %v436_v17, %v435_v16  ;;  %v96_v21 = vld [vmem:[%s2229_s1] sm:$0xff]  ;;  %v2104_v31 = vld [vmem:[#allocation2 + $0x8] sm:$0xff]  ;;  %v512_v58 = vld [vmem:[#allocation8 + $0x18] sm:$0xff]  ;;  %s1955_s27 = smov [#allocation11]  }
  0x4e   :  { %1722 = vmatpush3.bf16.msra.mxu0 %v1719_v3  ;;  %v2101_v25 = vsub.s32 0, %v313_v23  ;;  %v2106_v32 = vld [vmem:[#allocation2] sm:$0xff]  ;;  %vm89_vm2 = vcmp.gt.f32.partialorder %v2104_v31, 0.0  ;;  %v511_v57 = vld [vmem:[#allocation8 + $0x10] sm:$0xff]  ;;  %v2125_v5 = vld [vmem:[#allocation5] sm:$0xff]  ;;  %s1539_s28 = sshll.u32 %s1955_s27, 4  ;;  %s1540_s28 = int_to_ptr.vmem [resolvable:$true] %s1539_s28 }
  0x4f   :  { %1724 = vmatprep.subr.bf16.mxu1 %v1723_v6  ;;  %vm88_vm3 = vcmp.gt.f32.partialorder %v2106_v32, 0.0  ;;  %v1735_v60 = vpack.c.bf16 %v512_v58, %v511_v57  ;;  %vm91_vm4 = vcmp.gt.f32.partialorder %v2125_v5, 0.0  ;;  %v1579_v5 = vld [vmem:[%s2235_s7 + $0x3] ss:$0 sm:$0xff]  ;;  %s1890_s29 = scalar_lea.vmem %s1540_s28, 128  ;;  %p1895_p5 = scmp.lt.s32.totalorder %s1540_s28, %s1540_s28 }
  0x50   :  { %1726 = vmatpush3.bf16.msra.mxu1 %v1723_v6  ;;  %p1891_p4 = scmp.ne.s32.totalorder %s1540_s28, %s1890_s29  ;;  %p1896_p6 = scmp.lt.s32.totalorder %s1890_s29, %s1890_s29 }
  0x51   :  { %1634 = vmatmul.mubr.msk.f32.vlgmr.msra.gmra.mrb[0].mxu0 %vm99_vm0, %v95_v7  ;;  %1731 = vmatprep.subr.bf16.mxu1 %v1952_v18 }
  0x52   :  { %p1897_p7 = por %p1896_p6, %p1895_p5 }
  0x54   :  { %p1898_p8 = pnand %p1897_p7, %p1891_p4 }
 0x124   :  { %v1635_v8 = vpop.f32.mrb[0].mxu0 }
 0x125   :  { %v172_v9 = vpop.f32.mrb[1].mxu0 }
 0x126   :  { %v1727_v10 = vpack.c.bf16 %v1635_v8, %v172_v9  ;;  %1640 = vmatprep.mubr.msk.f32.mxu1 %vm99_vm0, %v172_v9 }
 0x127   :  { %1641 = vmatmul.mubr.msk.f32.vlgmr.msra.gmra.mrb[0].mxu1 %vm99_vm0, %v1635_v8 }
 0x128   :  { %1728 = vmatprep.subr.bf16.mxu0 %v1727_v10  ;;  %1654 = vmatprep.mubr.msk.f32.mxu1 %vm1953_vm1, %v1954_v20 }
 0x129   :  { %1730 = vmatpush3.bf16.msra.mxu0 %v1727_v10  ;;  %1733 = vmatpush3.bf16.msra.mxu1 %v1732_v19  ;;  %v2136_v19 = vld [vmem:[%s2232_s4] sm:$0xff] }
 0x12a   :  { %1734 = vmatprep.subr.bf16.mxu0 %v1952_v18  ;;  %1664 = vmatprep.subr.mxu1 %v1954_v20 }
 0x12c   :  { %1655 = vmatmul.mubr.msk.f32.vlgmr.msra.gmra.mrb[2].mxu1 %vm99_vm0, %v96_v21  ;;  %v1564_v21 = vld [vmem:[%s2235_s7 + $0x1] ss:$0 sm:$0xff] }
 0x12d   :  { %1666 = vmatprep.mubr.msk.f32.mxu1 %vm1953_vm1, %v1954_v20 }
 0x1fa   :  { %v1642_v12 = vpop.f32.mrb[0].mxu1 }
 0x1fb   :  { %v255_v13 = vpop.f32.mrb[1].mxu1 }
 0x1fc   :  { %305 = vperm.xlu1 %1776, %v255_v13   ;;  %266 = vrot.lane.b32.xlu0 %v255_v13, %s1951_s19 }
 0x1ff   :  { %v506_v51 = vpop.f32.mrb[2].mxu1 }
 0x200   :  { %309 = vperm.xlu1 %1776, %v1642_v12   ;;  %268 = vrot.lane.b32.xlu0 %v1642_v12, %s1951_s19  ;;  %v1656_v52 = vpop.f32.mrb[3].mxu1 }
 0x201   :  { %1665 = vmatpush3.msra.mxu1 %v506_v51 }
 0x26e   :  { %v267_v14 = vpop.permute.xlu0 %266 }
 0x26f   :  { %272 = vxpose.xlu0.b32.start [1/2] (short) (narrow) %v267_v14, 8 }
 0x272   :  { %v269_v15 = vpop.permute.xlu0 %268 }
 0x273   :  { %273 = vxpose.xlu0.b32.end [2/2] (short) (narrow) %v269_v15, 8 }
 0x27b   :  { %v306_v24 = vpop.permute.xlu1 %305 }
 0x27f   :  { %v310_v28 = vpop.permute.xlu1 %309 }
 0x29c   :  { %1777 = vset.pattern.permute.xlu0 %v1950_v11 }
 0x2ef   :  { %v288_v26 = vpop.trf.xlu0 }
 0x2f0   :  { %v315_v27 = vrot.slane %v288_v26, %v2101_v25  ;;  %v2146_v26 = vld [vmem:[%s2232_s4 + $0x8] sm:$0xff] }
 0x2f2   :  { %v316_v29 = vadd.f32 %v315_v27, %v306_v24  ;;  %v317_v30 = vadd.f32 %v315_v27, %v310_v28  ;;  %v811_v27 = vld [vmem:[#allocation7 + $0x20] sm:$0xff]  ;;  %v812_v28 = vld [vmem:[#allocation7 + $0x28] sm:$0xff] }
 0x2f4   :  { %v318_v33 = vmul.f32 0.2, %v316_v29  ;;  %v319_v34 = vmul.f32 0.2, %v317_v30 }
 0x2f6   :  { %v321_v35 = vmax.f32 %v317_v30, %v319_v34  ;;  %v320_v36 = vmax.f32 %v316_v29, %v318_v33  ;;  %v1737_v29 = vpack.c.bf16 %v812_v28, %v811_v27  ;;  %v895_v30 = vld [vmem:[#allocation8 + $0x20] sm:$0xff]  ;;  %v896_v33 = vld [vmem:[#allocation8 + $0x28] sm:$0xff] }
 0x2f7   :  { %v1741_v34 = vpack.c.bf16 %v896_v33, %v895_v30 }
 0x2f8   :  { %v323_v37 = vsel %vm89_vm2, %v321_v35, -1e+30  ;;  %v322_v38 = vsel %vm88_vm3, %v320_v36, -1e+30  ;;  %1738 = vmatprep.subr.bf16.mxu1 %v1737_v29  ;;  %v1558_v35 = vld [vmem:[%s2235_s7] ss:$0 sm:$0xff] }
 0x2f9   :  { %v327_v39 = vsel %vm99_vm0, %v323_v37, -inf  ;;  %v324_v40 = vsel %vm99_vm0, %v322_v38, -inf }
 0x2fa   :  { %328 = vmax.xlane.f32.xlu0 %v327_v39  ;;  %325 = vmax.xlane.f32.xlu1 %v324_v40  ;;  %v1150_v40 = vld [vmem:[#allocation7 + $0x30] sm:$0xff] }
 0x387   :  { %v329_v41 = vpop.xlane.xlu0 %328  ;;  %v326_v42 = vpop.xlane.xlu1 %325 }
 0x388   :  { %v331_v43 = vsub.f32 %v323_v37, %v329_v41  ;;  %v330_v44 = vsub.f32 %v322_v38, %v326_v42  ;;  %v1151_v41 = vld [vmem:[#allocation7 + $0x38] sm:$0xff] }
 0x38a   :  { %v332_v45 = vmul.f32 1.442695, %v330_v44  ;;  %v334_v46 = vmul.f32 1.442695, %v331_v43  ;;  %v1750_v43 = vpack.c.bf16 %v1151_v41, %v1150_v40 }
 0x38c   :  { %1778 = vpow2.f32 %v332_v45 }
 0x38d   :  { %1780 = vpow2.f32 %v334_v46 }
 0x396   :  { %v1779_v47 = vpop.eup %1778 }
 0x397   :  { %v336_v48 = vsel %vm99_vm0, %v1779_v47, 0.0  ;;  %v1781_v49 = vpop.eup %1780 }
 0x398   :  { %337 = vadd.xlane.f32.xlu1 %v336_v48  ;;  %v339_v50 = vsel %vm99_vm0, %v1781_v49, 0.0 }
 0x39c   :  { %340 = vadd.xlane.f32.xlu1 %v339_v50 }
 0x425   :  { %v338_v53 = vpop.xlane.xlu1 %337 }
 0x426   :  { %1782 = vrcp.f32 %v338_v53 }
 0x429   :  { %v341_v54 = vpop.xlane.xlu1 %340 }
 0x42a   :  { %1784 = vrcp.f32 %v341_v54 }
 0x430   :  { %v1783_v55 = vpop.eup %1782 }
 0x431   :  { %v344_v56 = vmul.f32 %v1783_v55, %v1779_v47 }
 0x433   :  { %1647 = vmatprep.mubr.msk.f32.mxu0 %vm99_vm0, %v344_v56 }
 0x434   :  { %v1785_v59 = vpop.eup %1784 }
 0x435   :  { %v345_v61 = vmul.f32 %v1785_v59, %v1781_v49 }
 0x437   :  { %1648 = vmatmul.mubr.msk.f32.vlgmr.msra.gmra.mrb[2].mxu0 %vm99_vm0, %v345_v61 }
 0x438   :  { %1736 = vmatpush3.bf16.msra.mxu0 %v1735_v60  ;;  %1661 = vmatprep.mubr.msk.f32.mxu0 %vm1953_vm1, %v1954_v20 }
 0x43b   :  { %1662 = vmatmul.mubr.msk.f32.vlgmr.msra.gmra.mrb[4].mxu0 %vm99_vm0, %v506_v51 }
 0x43c   :  { %1671 = vmatprep.mubr.msk.f32.mxu0 %vm634_vm5, %v2136_v19 }
 0x50e   :  { %v582_v62 = vpop.f32.mrb[4].mxu0 }
 0x50f   :  { %587 = vrot.lane.b32.xlu1 %v582_v62, %s1951_s19  ;;  %v1663_v63 = vpop.f32.mrb[5].mxu0 }
 0x513   :  { %623 = vperm.xlu1 %1776, %v582_v62  }
 0x581   :  { %v588_v0 = vpop.permute.xlu1 %587 }
 0x582   :  { %590 = vxpose.xlu1.b32.start.end [1/1] (short) (narrow) %v588_v0, 8 }
 0x592   :  { %v624_v1 = vpop.permute.xlu1 %623 }
 0x602   :  { %v606_v2 = vpop.trf.xlu1 }
 0x603   :  { %v629_v3 = vrot.slane %v606_v2, %v2101_v25 }
 0x605   :  { %v630_v4 = vadd.f32 %v629_v3, %v624_v1 }
 0x607   :  { %v631_v6 = vmul.f32 0.2, %v630_v4 }
 0x609   :  { %v632_v7 = vmax.f32 %v630_v4, %v631_v6 }
 0x60b   :  { %v633_v8 = vsel %vm91_vm4, %v632_v7, -1e+30 }
 0x60c   :  { %v635_v9 = vsel %vm634_vm5, %v633_v8, -inf }
 0x60d   :  { %636 = vmax.xlane.f32.xlu0 %v635_v9 }
 0x69a   :  { %v637_v10 = vpop.xlane.xlu0 %636 }
 0x69b   :  { %v638_v11 = vsub.f32 %v633_v8, %v637_v10 }
 0x69d   :  { %v639_v12 = vmul.f32 1.442695, %v638_v11 }
 0x69f   :  { %1786 = vpow2.f32 %v639_v12 }
 0x6a9   :  { %v1787_v13 = vpop.eup %1786 }
 0x6aa   :  { %v641_v14 = vsel %vm634_vm5, %v1787_v13, 0.0 }
 0x6ab   :  { %642 = vadd.xlane.f32.xlu0 %v641_v14  ;;  %v1226_v14 = vld [vmem:[#allocation8 + $0x30] sm:$0xff] }
 0x738   :  { %v643_v15 = vpop.xlane.xlu0 %642 }
 0x739   :  { %1788 = vrcp.f32 %v643_v15  ;;  %v1227_v15 = vld [vmem:[#allocation8 + $0x38] sm:$0xff] }
 0x743   :  { %v1789_v16 = vpop.eup %1788 }
 0x744   :  { %v645_v17 = vmul.f32 %v1789_v16, %v1787_v13 }
 0x746   :  { %1667 = vmatmul.mubr.msk.f32.vlgmr.msra.gmra.mrb[4].mxu1 %vm634_vm5, %v645_v17  ;;  %v1753_v17 = vpack.c.bf16 %v1227_v15, %v1226_v14 }
 0x747   :  { %1740 = vmatpush3.bf16.msra.mxu1 %v1737_v29 }
 0x819   :  { %v723_v22 = vpop.f32.mrb[4].mxu1 }
 0x81a   :  { %v724_v23 = vadd.f32 %v1564_v21, %v723_v22  ;;  %v1668_v24 = vpop.f32.mrb[5].mxu1 }
 0x81c   :  { %1669 = vmatprep.subr.mxu0 %v724_v23 }
 0x81d   :  { %1670 = vmatpush3.msra.mxu0 %v724_v23 }
 0x81e   :  { %1672 = vmatmul.mubr.msk.f32.vlgmr.msra.gmra.mrb[2].mxu0 %vm634_vm5, %v2146_v26  ;;  %1742 = vmatprep.subr.bf16.mxu0 %v1741_v34 }
 0x81f   :  { %1744 = vmatpush3.bf16.msra.mxu0 %v1741_v34 }
 0x820   :  { %1749 = vmatprep.subr.bf16.mxu0 %v1952_v18 }
 0x8f1   :  { %v1673_v36 = vpop.f32.mrb[2].mxu0 }
 0x8f2   :  { %v799_v37 = vpop.f32.mrb[3].mxu0  ;;  %v1755_v39 = vadd.f32 %v1673_v36, %v1558_v35 }
 0x8f3   :  { %v1756_v38 = vadd.f32 %v1558_v35, %v799_v37 }
 0x8f5   :  { %1678 = vmatprep.mubr.msk.f32.mxu1 %vm99_vm0, %v1756_v38 }
 0x8f6   :  { %1679 = vmatmul.mubr.msk.f32.vlgmr.msra.gmra.mrb[6].mxu1 %vm99_vm0, %v1755_v39 }
 0x9c9   :  { %v1680_v42 = vpop.f32.mrb[6].mxu1 }
 0x9ca   :  { %v885_v44 = vpop.f32.mrb[7].mxu1 }
 0x9cb   :  { %v1745_v45 = vpack.c.bf16 %v1680_v42, %v885_v44  ;;  %1685 = vmatprep.mubr.msk.f32.mxu0 %vm99_vm0, %v885_v44 }
 0x9cc   :  { %1686 = vmatmul.mubr.msk.f32.vlgmr.msra.gmra.mrb[6].mxu0 %vm99_vm0, %v1680_v42 }
 0x9cd   :  { %1746 = vmatprep.subr.bf16.mxu1 %v1745_v45  ;;  %1751 = vmatpush3.bf16.msra.mxu0 %v1750_v43 }
 0x9ce   :  { %1748 = vmatpush3.bf16.msra.mxu1 %v1745_v45  ;;  %1699 = vmatprep.mubr.msk.f32.mxu0 %vm1953_vm1, %v1954_v20 }
 0x9cf   :  { %1709 = vmatprep.subr.mxu0 %v1954_v20  ;;  %1752 = vmatprep.subr.bf16.mxu1 %v1952_v18 }
 0x9d0   :  { %1700 = vmatmul.mubr.msk.f32.vlgmr.msra.gmra.mrb[8].mxu0 %vm99_vm0, %v724_v23 }
 0x9d1   :  { %1711 = vmatprep.mubr.msk.f32.mxu0 %vm1953_vm1, %v1954_v20 }
 0xa9f   :  { %v1687_v46 = vpop.f32.mrb[6].mxu0 }
 0xaa0   :  { %982 = vrot.lane.b32.xlu1 %v1687_v46, %s1951_s19  ;;  %v969_v47 = vpop.f32.mrb[7].mxu0 }
 0xaa1   :  { %980 = vrot.lane.b32.xlu0 %v969_v47, %s1951_s19 }
 0xaa3   :  { %v1221_v48 = vpop.f32.mrb[8].mxu0 }
 0xaa4   :  { %v1701_v49 = vpop.f32.mrb[9].mxu0  ;;  %1710 = vmatpush3.msra.mxu0 %v1221_v48 }
 0xaa5   :  { %1023 = vperm.xlu0 %1777, %v1687_v46  }
 0xaa9   :  { %1019 = vperm.xlu0 %1777, %v969_v47  }
 0xb12   :  { %v983_v51 = vpop.permute.xlu1 %982 }
 0xb13   :  { %v981_v50 = vpop.permute.xlu0 %980 }
 0xb14   :  { %986 = vxpose.xlu0.b32.start [1/2] (short) (narrow) %v981_v50, 8 }
 0xb18   :  { %987 = vxpose.xlu0.b32.end [2/2] (short) (narrow) %v983_v51, 8 }
 0xb24   :  { %v1024_v18 = vpop.permute.xlu0 %1023 }
 0xb28   :  { %v1020_v52 = vpop.permute.xlu0 %1019 }
 0xb94   :  { %v1002_v53 = vpop.trf.xlu0 }
 0xb95   :  { %v1029_v54 = vrot.slane %v1002_v53, %v2101_v25 }
 0xb97   :  { %v1030_v55 = vadd.f32 %v1029_v54, %v1020_v52  ;;  %v1031_v56 = vadd.f32 %v1029_v54, %v1024_v18 }
 0xb99   :  { %v1032_v57 = vmul.f32 0.2, %v1030_v55  ;;  %v1033_v58 = vmul.f32 0.2, %v1031_v56 }
 0xb9b   :  { %v1035_v59 = vmax.f32 %v1031_v56, %v1033_v58  ;;  %v1034_v60 = vmax.f32 %v1030_v55, %v1032_v57 }
 0xb9d   :  { %v1037_v61 = vsel %vm89_vm2, %v1035_v59, -1e+30  ;;  %v1036_v62 = vsel %vm88_vm3, %v1034_v60, -1e+30 }
 0xb9e   :  { %v1041_v63 = vsel %vm99_vm0, %v1037_v61, -inf  ;;  %v1038_v0 = vsel %vm99_vm0, %v1036_v62, -inf }
 0xb9f   :  { %1042 = vmax.xlane.f32.xlu0 %v1041_v63  ;;  %1039 = vmax.xlane.f32.xlu1 %v1038_v0 }
 0xc2c   :  { %v1043_v1 = vpop.xlane.xlu0 %1042  ;;  %v1040_v2 = vpop.xlane.xlu1 %1039 }
 0xc2d   :  { %v1045_v3 = vsub.f32 %v1037_v61, %v1043_v1  ;;  %v1044_v4 = vsub.f32 %v1036_v62, %v1040_v2 }
 0xc2f   :  { %v1046_v6 = vmul.f32 1.442695, %v1044_v4  ;;  %v1048_v7 = vmul.f32 1.442695, %v1045_v3 }
 0xc31   :  { %1790 = vpow2.f32 %v1046_v6 }
 0xc32   :  { %1792 = vpow2.f32 %v1048_v7 }
 0xc3b   :  { %v1791_v8 = vpop.eup %1790 }
 0xc3c   :  { %v1050_v31 = vsel %vm99_vm0, %v1791_v8, 0.0  ;;  %v1793_v9 = vpop.eup %1792 }
 0xc3d   :  { %1051 = vadd.xlane.f32.xlu1 %v1050_v31  ;;  %v1053_v32 = vsel %vm99_vm0, %v1793_v9, 0.0 }
 0xc41   :  { %1054 = vadd.xlane.f32.xlu1 %v1053_v32 }
 0xcca   :  { %v1052_v10 = vpop.xlane.xlu1 %1051 }
 0xccb   :  { %1794 = vrcp.f32 %v1052_v10 }
 0xcce   :  { %v1055_v11 = vpop.xlane.xlu1 %1054 }
 0xccf   :  { %1796 = vrcp.f32 %v1055_v11 }
 0xcd5   :  { %v1795_v12 = vpop.eup %1794 }
 0xcd6   :  { %v1058_v13 = vmul.f32 %v1795_v12, %v1791_v8 }
 0xcd8   :  { %1692 = vmatprep.mubr.msk.f32.mxu1 %vm99_vm0, %v1058_v13 }
 0xcd9   :  { %v1797_v16 = vpop.eup %1796 }
 0xcda   :  { %v1059_v21 = vmul.f32 %v1797_v16, %v1793_v9 }
 0xcdc   :  { %1693 = vmatmul.mubr.msk.f32.vlgmr.msra.gmra.mrb[8].mxu1 %vm99_vm0, %v1059_v21 }
 0xcdd   :  { %1754 = vmatpush3.bf16.msra.mxu1 %v1753_v17  ;;  %1706 = vmatprep.mubr.msk.f32.mxu1 %vm1953_vm1, %v1954_v20 }
 0xce0   :  { %1707 = vmatmul.mubr.msk.f32.vlgmr.msra.gmra.mrb[10].mxu1 %vm99_vm0, %v1221_v48 }
 0xce1   :  { %1716 = vmatprep.mubr.msk.f32.mxu1 %vm634_vm5, %v2136_v19 }
 0xdb3   :  { %v1297_v22 = vpop.f32.mrb[10].mxu1 }
 0xdb4   :  { %1302 = vrot.lane.b32.xlu1 %v1297_v22, %s1951_s19  ;;  %v1708_v23 = vpop.f32.mrb[11].mxu1 }
 0xdb8   :  { %1338 = vperm.xlu1 %1776, %v1297_v22  }
 0xe26   :  { %v1303_v24 = vpop.permute.xlu1 %1302 }
 0xe27   :  { %1305 = vxpose.xlu0.b32.start.end [1/1] (short) (narrow) %v1303_v24, 8 }
 0xe37   :  { %v1339_v29 = vpop.permute.xlu1 %1338 }
 0xea7   :  { %v1321_v27 = vpop.trf.xlu0 }
 0xea8   :  { %v1344_v28 = vrot.slane %v1321_v27, %v2101_v25 }
 0xeaa   :  { %v1345_v30 = vadd.f32 %v1344_v28, %v1339_v29 }
 0xeac   :  { %v1346_v33 = vmul.f32 0.2, %v1345_v30 }
 0xeae   :  { %v1347_v34 = vmax.f32 %v1345_v30, %v1346_v33 }
 0xeb0   :  { %v1348_v20 = vsel %vm91_vm4, %v1347_v34, -1e+30 }
 0xeb1   :  { %v1349_v35 = vsel %vm634_vm5, %v1348_v20, -inf }
 0xeb2   :  { %1350 = vmax.xlane.f32.xlu1 %v1349_v35 }
 0xf3f   :  { %v1351_v19 = vpop.xlane.xlu1 %1350 }
 0xf40   :  { %v1352_v36 = vsub.f32 %v1348_v20, %v1351_v19 }
 0xf42   :  { %v1353_v37 = vmul.f32 1.442695, %v1352_v36 }
 0xf44   :  { %1798 = vpow2.f32 %v1353_v37 }
 0xf4e   :  { %v1799_v38 = vpop.eup %1798 }
 0xf4f   :  { %v1355_v39 = vsel %vm634_vm5, %v1799_v38, 0.0 }
 0xf50   :  { %1356 = vadd.xlane.f32.xlu1 %v1355_v39 }
 0xfdd   :  { %v1357_v40 = vpop.xlane.xlu1 %1356 }
 0xfde   :  { %1800 = vrcp.f32 %v1357_v40 }
 0xfe8   :  { %v1801_v25 = vpop.eup %1800 }
 0xfe9   :  { %v1359_v41 = vmul.f32 %v1801_v25, %v1799_v38 }
 0xfeb   :  { %1712 = vmatmul.mubr.msk.f32.vlgmr.msra.gmra.mrb[10].mxu0 %vm634_vm5, %v1359_v41 }
0x10be   :  { %v1437_v42 = vpop.f32.mrb[10].mxu0 }
0x10bf   :  { %v1438_v43 = vadd.f32 %v1579_v5, %v1437_v42  ;;  %v1713_v44 = vpop.f32.mrb[11].mxu0 }
0x10c1   :  { %1520 = vst.msk [vmem:[#allocation11] sm:$0xff] %vm99_vm0, %v1438_v43  ;;  %1714 = vmatprep.subr.mxu1 %v1438_v43 }
0x10c2   :  { %1715 = vmatpush3.msra.mxu1 %v1438_v43 }
0x10c3   :  { %1717 = vmatmul.mubr.msk.f32.vlgmr.msra.gmra.mrb[8].mxu1 %vm634_vm5, %v2146_v26 }
0x10c4   :  { %1901 = shalt.err (!%p1898_p8)
}
0x10c5   :  { %s1902_s13 = scalar_lea.hbm %s2237_s9, 128 }
0x10c6   :  { %p1903_p9 = scmp.ne.s32.totalorder %s2237_s9, %s1902_s13  ;;  %p1906_p10 = scmp.lt.u32.totalorder %s1902_s13, %s2237_s9 }
0x10c8   :  { %p1908_p11 = pnand %p1906_p10, %p1903_p9 }
0x10ca   :  { %1911 = shalt.err (!%p1908_p11)
}
0x10cb   :  { %1542 = dma.vmem_to_hbm [thread:$0]  %s1540_s28, 128, %s2237_s9, [#allocation12]   ;;  %v1573_v26 = vld [vmem:[%s2235_s7 + $0x2] ss:$0 sm:$0xff] }
0x10cc   :  { %s1956_s0 = smov [#allocation10]  }
0x10cd   :  { %s1526_s20 = sshll.u32 %s1956_s0, 4  ;;  %s1527_s20 = int_to_ptr.vmem [resolvable:$true] %s1526_s20 }
0x10ce   :  { %s1912_s1 = scalar_lea.vmem %s1527_s20, 256  ;;  %p1917_p13 = scmp.lt.s32.totalorder %s1527_s20, %s1527_s20 }
0x10cf   :  { %p1913_p12 = scmp.ne.s32.totalorder %s1527_s20, %s1912_s1  ;;  %p1918_p0 = scmp.lt.s32.totalorder %s1912_s1, %s1912_s1 }
0x10d1   :  { %p1919_p1 = por %p1918_p0, %p1917_p13 }
0x10d3   :  { %p1920_p2 = pnand %p1919_p1, %p1913_p12 }
0x1196   :  { %v1718_v45 = vpop.f32.mrb[8].mxu1 }
0x1197   :  { %v1757_v46 = vadd.f32 %v1718_v45, %v1573_v26  ;;  %v1507_v47 = vpop.f32.mrb[9].mxu1 }
0x1198   :  { %v1758_v48 = vadd.f32 %v1573_v26, %v1507_v47 }
0x1199   :  { %1519 = vst.msk [vmem:[#allocation10 + $0x8] sm:$0xff] %vm99_vm0, %v1757_v46 }
0x119a   :  { %1518 = vst.msk [vmem:[#allocation10] sm:$0xff] %vm99_vm0, %v1758_v48 }
0x119b   :  { %1923 = shalt.err (!%p1920_p2)
}
0x119c   :  { %s1924_s21 = scalar_lea.hbm %s2236_s8, 256 }
0x119d   :  { %p1925_p3 = scmp.ne.s32.totalorder %s2236_s8, %s1924_s21  ;;  %p1928_p4 = scmp.lt.u32.totalorder %s1924_s21, %s2236_s8 }
0x119f   :  { %p1930_p5 = pnand %p1928_p4, %p1925_p3 }
0x11a1   :  { %1933 = shalt.err (!%p1930_p5)
}
0x11a2   :  { %1532 = dma.vmem_to_hbm [thread:$0]  %s1527_s20, 256, %s2236_s8, [#allocation4], %s1946_s3, %s1946_s3, %s1947_s10  }
0x11a3   :  { %1940 = dma.done.wait [#allocation4], 256  }
0x11a4   :  { %1941 = vsyncadd [#allocation4], 4294967040 }
0x11a5   :  { %1942 = dma.done.wait [#allocation12], 128  }
0x11a6   :  { %1943 = vsyncadd [#allocation12], 4294967168 }
0x11a7   :  { %1549 = vsyncpa [#allocation3], 1 }
0x11a8   :  { %1550 = vsyncpa [#allocation6], 1 }
0x11a9   :  { %1551 = vsyncpa [#allocation9], 1 }
0x11aa   :  { %1552 = vsyncpa [#allocation4], 1 }
0x11ab   :  { %1553 = vsyncpa [#allocation12], 1 }

</bundles_post_ra>
